<compile_context>
chip_gen: v6e
topology: v6e:2x2x1
jax: 0.10.0
libtpu: 0.0.40
codegen_flags: <defaults>
</compile_context>

<pallas_src>
import math
import numpy as np

import jax
import jax.numpy as jnp
from jax import lax
from jax.experimental import pallas as pl
from jax.experimental.pallas import tpu as pltpu

KLEN = 31    # Gaussian kernel size used by HA
PAD = 15     # conv2d padding
THRESH = 0.05
EPS = 1e-8


# ---------------------------------------------------------------------------
# Deterministic parameter construction (same math as gkern(31, 4), no scipy).
# ---------------------------------------------------------------------------
def _norm_cdf(v):
    return 0.5 * (1.0 + math.erf(v / math.sqrt(2.0)))


def gkern(kernlen=16, nsig=3):
    interval = (2 * nsig + 1.0) / kernlen
    x = np.linspace(-nsig - interval / 2.0, nsig + interval / 2.0, kernlen + 1)
    cdf = np.array([_norm_cdf(v) for v in x])
    kern1d = np.diff(cdf)
    kernel_raw = np.sqrt(np.outer(kern1d, kern1d))
    return kernel_raw / kernel_raw.sum()


def gkern_1d_factor(kernlen=KLEN, nsig=4):
    """u such that outer(u, u) == gkern(kernlen, nsig) (exact rank-1 factor)."""
    interval = (2 * nsig + 1.0) / kernlen
    x = np.linspace(-nsig - interval / 2.0, nsig + interval / 2.0, kernlen + 1)
    cdf = np.array([_norm_cdf(v) for v in x])
    kern1d = np.diff(cdf)
    s = np.sqrt(kern1d)
    return s / s.sum()


def make_row_band(u, H):
    """R[i, i'] = u[i' - i + PAD] for |i' - i| <= PAD (zero padding absorbed)."""
    R = np.zeros((H, H), np.float64)
    for i in range(H):
        for i2 in range(max(0, i - PAD), min(H, i + PAD + 1)):
            R[i, i2] = u[i2 - i + PAD]
    return jnp.asarray(R, jnp.float32)


def make_col_band(u, W):
    """B[j', j] = u[j' - j + PAD] for |j' - j| <= PAD (zero padding absorbed)."""
    B = np.zeros((W, W), np.float64)
    for j in range(W):
        for j2 in range(max(0, j - PAD), min(W, j + PAD + 1)):
            B[j2, j] = u[j2 - j + PAD]
    return jnp.asarray(B, jnp.float32)


# ---------------------------------------------------------------------------
# Kernel A: binary Soft_Att mask (conv via 2 small matmuls + minmax + thresh).
# One batch element per grid step; mask is emitted in x.dtype.
# ---------------------------------------------------------------------------
def mask_kernel(rband_ref, cband_ref, attn_ref, mask_ref):
    a = attn_ref[0]                                                  # (H, W) f32
    tmp = jnp.dot(rband_ref[...], a, preferred_element_type=jnp.float32)
    conv = jnp.dot(tmp, cband_ref[...], preferred_element_type=jnp.float32)

    mx = jnp.max(conv)
    mn = jnp.min(conv)
    soft = (conv - mn) / (mx - mn + EPS)

    s = jnp.maximum(soft, a)
    # where(s > 0.05, 1, s); where(s <= 0.05, 0, s)  ==  binary mask (s > 0.05)
    mask_ref[0] = (s > THRESH).astype(mask_ref.dtype)


# ---------------------------------------------------------------------------
# Kernel B: lane-dense feature masking on flattened (CT, H*W) slabs in x.dtype.
# Grid = (batch, channel-tile), both parallel.
# ---------------------------------------------------------------------------
def apply_kernel(mask_ref, x_ref, pos_ref, neg_ref):
    m = mask_ref[0]            # (1, HW)   binary mask, broadcast over channels
    xb = x_ref[0]              # (CT, HW)  native dtype
    p = xb * m
    pos_ref[0] = p
    neg_ref[0] = xb - p        # == x * (1 - m) exactly, since m ∈ {0, 1}


# ---------------------------------------------------------------------------
# Wrapper helpers
# ---------------------------------------------------------------------------
def _vmem_capacity_bytes():
    try:
        info = pltpu.get_tpu_info()
        for name in ("vmem_capacity_bytes", "vmem_size_bytes", "vmem_bytes"):
            v = getattr(info, name, None)
            if v:
                return int(v)
    except Exception:
        pass
    return 64 << 20          # conservative: v7x per-TensorCore VMEM


def _vmem_limit(resident_bytes, vmem_cap):
    # headroom + 4 MiB slack, floored at 16 MiB, capped below physical VMEM.
    return int(min(max(3 * resident_bytes + (4 << 20), 16 << 20),
                   (vmem_cap * 3) // 4))


def _pick_c_tile(N, C, HW, itemsize, vmem_cap):
    """Channel tile: largest that keeps double-buffered residency within budget.

    Budget ≈ VMEM/8  (→ ~16 MiB on 128 MiB v5e/v6e, ~8 MiB on 64 MiB v7x).
    No divisibility-of-C requirement (grid uses cdiv; ragged last tile is OK),
    and the CT=C fallback is only taken when it actually fits the budget.
    """
    budget = max(vmem_cap // 8, 4 << 20)
    per_c = 3 * HW * itemsize                       # x + pos + neg, one channel
    avail = budget // 2 - HW * itemsize             # /2: double buffering; - mask
    ct = max(avail // per_c, 1)
    if ct >= C:
        ct = C
    else:
        ct = max(8, (ct // 8) * 8)                  # sublane-aligned partial tile
        ct = min(ct, C)
    # v7x: keep >= 2 parallel grid steps so both TensorCores get work.
    if N == 1 and ct >= C and C >= 16:
        ct = max(8, (C // 2) // 8 * 8)
    return ct


# ---------------------------------------------------------------------------
# Forward
# ---------------------------------------------------------------------------
def ha_forward(attention, x, *, nsig=4):
    N, _, H, W = attention.shape
    C = x.shape[1]
    HW = H * W
    x_dtype = x.dtype
    isz = jnp.dtype(x_dtype).itemsize
    vmem_cap = _vmem_capacity_bytes()

    u = gkern_1d_factor(KLEN, nsig)
    rband = make_row_band(u, H)               # (H, H) f32
    cband = make_col_band(u, W)               # (W, W) f32

    attn2d = attention[:, 0].astype(jnp.float32)          # (N, H, W)

    # ---- Kernel A: binary Soft_Att mask per batch element (f32 math) ----
    mask_resident = 4 * (H * H + W * W + 4 * H * W) + isz * H * W
    mask = pl.pallas_call(
        mask_kernel,
        out_shape=jax.ShapeDtypeStruct((N, H, W), x_dtype),
        grid_spec=pltpu.PrefetchScalarGridSpec(
            num_scalar_prefetch=0,
            grid=(N,),
            in_specs=[
                pl.BlockSpec((H, H), lambda b: (0, 0)),        # row band (const)
                pl.BlockSpec((W, W), lambda b: (0, 0)),        # col band (const)
                pl.BlockSpec((1, H, W), lambda b: (b, 0, 0)),  # attention
            ],
            out_specs=pl.BlockSpec((1, H, W), lambda b: (b, 0, 0)),
        ),
        compiler_params=pltpu.CompilerParams(
            dimension_semantics=("parallel",),
            vmem_limit_bytes=_vmem_limit(mask_resident, vmem_cap)),
        cost_estimate=pl.CostEstimate(
            flops=int(2 * N * H * W * (H + W)),
            transcendentals=0,
            bytes_accessed=int(N * H * W * (4 + isz) + 4 * (H * H + W * W))),
    )(rband, cband, attn2d)

    # ---- Lane-dense flattened views (free reshapes of contiguous arrays) ----
    x_flat = x.reshape(N, C, HW)              # native dtype, no pad, no astype
    m_flat = mask.reshape(N, 1, HW)           # tiny array, free reshape

    CT = _pick_c_tile(N, C, HW, isz, vmem_cap)
    grid = (N, pl.cdiv(C, CT))
    block_bytes = isz * HW * (1 + 3 * CT)     # mask + x + pos + neg per step

    pos_f, neg_f = pl.pallas_call(
        apply_kernel,
        out_shape=(jax.ShapeDtypeStruct((N, C, HW), x_dtype),
                   jax.ShapeDtypeStruct((N, C, HW), x_dtype)),
        grid_spec=pltpu.PrefetchScalarGridSpec(
            num_scalar_prefetch=0,
            grid=grid,
            in_specs=[
                pl.BlockSpec((1, 1, HW), lambda b, ct: (b, 0, 0)),   # mask
                pl.BlockSpec((1, CT, HW), lambda b, ct: (b, ct, 0)),  # x
            ],
            out_specs=[
                pl.BlockSpec((1, CT, HW), lambda b, ct: (b, ct, 0)),
                pl.BlockSpec((1, CT, HW), lambda b, ct: (b, ct, 0)),
            ],
        ),
        compiler_params=pltpu.CompilerParams(
            dimension_semantics=("parallel", "parallel"),
            vmem_limit_bytes=_vmem_limit(2 * block_bytes, vmem_cap)),
        cost_estimate=pl.CostEstimate(
            flops=int(2 * N * C * HW),
            transcendentals=0,
            bytes_accessed=int((3 * N * C * HW + N * HW) * isz)),
    )(m_flat, x_flat)

    pos = pos_f.reshape(N, C, H, W)
    neg = neg_f.reshape(N, C, H, W)
    return pos, neg


# ---------------------------------------------------------------------------
# Pure-JAX reference (mirrors the PyTorch forward exactly: full 2-D kernel).
# ---------------------------------------------------------------------------
def ha_reference(attention, x, *, nsig=4):
    k = jnp.asarray(np.float32(gkern(KLEN, nsig)))[None, None]      # (1,1,31,31)
    conv = lax.conv_general_dilated(
        attention, k, window_strides=(1, 1),
        padding=[(PAD, PAD), (PAD, PAD)],
        dimension_numbers=("NCHW", "OIHW", "NCHW"))
    mx = conv.max(axis=(2, 3), keepdims=True)
    mn = conv.min(axis=(2, 3), keepdims=True)
    soft = (conv - mn) / (mx - mn + EPS)
    s = jnp.maximum(soft, attention)
    s = jnp.where(s > THRESH, 1.0, s)
    s = jnp.where(s <= THRESH, 0.0, s)
    return x * s, x * (1.0 - s)


if __name__ == "__main__":
    N, C, H, W = 2, 4, 16, 16

    key = jax.random.PRNGKey(0)
    k1, k2 = jax.random.split(key)
    attention = jax.random.uniform(k1, (N, 1, H, W), dtype=jnp.float32)
    x = jax.random.uniform(k2, (N, C, H, W), dtype=jnp.float32)

    fwd = jax.jit(ha_forward)
    pos, neg = fwd(attention, x)
    pos = jax.block_until_ready(pos)
    neg = jax.block_until_ready(neg)

    pos_ref, neg_ref = ha_reference(attention, x)
    np.testing.assert_allclose(np.asarray(pos), np.asarray(pos_ref),
                               rtol=1e-5, atol=1e-5)
    np.testing.assert_allclose(np.asarray(neg), np.asarray(neg_ref),
                               rtol=1e-5, atol=1e-5)

    print("KERNEL_OK")
</pallas_src>

<mosaic_0001>
module attributes {stable_mosaic.version = 11 : i64} {
  func.func @apply_kernel(%arg0: i32, %arg1: i32, %arg2: memref<1x1x256xf32, #tpu.memory_space<vmem>>, %arg3: memref<1x4x256xf32, #tpu.memory_space<vmem>>, %arg4: memref<1x4x256xf32, #tpu.memory_space<vmem>>, %arg5: memref<1x4x256xf32, #tpu.memory_space<vmem>>) attributes {dimension_semantics = [#tpu.dimension_semantics<parallel>, #tpu.dimension_semantics<parallel>], iteration_bounds = array<i64: 2, 1>, scalar_prefetch = 0 : i64, scratch_operands = 0 : i64, tpu.core_type = #tpu.core_type<tc>, window_params = [{transform_indices = @transform_0, window_bounds = array<i64: 1, 1, 256>}, {transform_indices = @transform_1, window_bounds = array<i64: 1, 4, 256>}, {transform_indices = @transform_2, window_bounds = array<i64: 1, 4, 256>}, {transform_indices = @transform_3, window_bounds = array<i64: 1, 4, 256>}]} {
    %c0 = arith.constant 0 : index
    %c0_0 = arith.constant 0 : index
    %c0_1 = arith.constant 0 : index
    %0 = vector.load %arg2[%c0, %c0_0, %c0_1] : memref<1x1x256xf32, #tpu.memory_space<vmem>>, vector<1x1x256xf32>
    %1 = vector.shape_cast %0 : vector<1x1x256xf32> to vector<1x256xf32>
    %c0_2 = arith.constant 0 : index
    %c0_3 = arith.constant 0 : index
    %c0_4 = arith.constant 0 : index
    %2 = vector.load %arg3[%c0_2, %c0_3, %c0_4] : memref<1x4x256xf32, #tpu.memory_space<vmem>>, vector<1x4x256xf32>
    %3 = vector.shape_cast %2 : vector<1x4x256xf32> to vector<4x256xf32>
    %4 = vector.broadcast %1 : vector<1x256xf32> to vector<4x256xf32>
    %5 = arith.mulf %3, %4 : vector<4x256xf32>
    %c0_5 = arith.constant 0 : index
    %c0_6 = arith.constant 0 : index
    %c0_7 = arith.constant 0 : index
    %6 = vector.load %arg4[%c0_5, %c0_6, %c0_7] : memref<1x4x256xf32, #tpu.memory_space<vmem>>, vector<1x4x256xf32>
    %7 = vector.shape_cast %6 : vector<1x4x256xf32> to vector<4x256xf32>
    %8 = vector.shape_cast %5 : vector<4x256xf32> to vector<1x4x256xf32>
    tpu.vector_store %arg4[%c0_5, %c0_6, %c0_7], %8 {strides = array<i32>} : memref<1x4x256xf32, #tpu.memory_space<vmem>>, vector<1x4x256xf32>,
    %9 = arith.subf %3, %5 : vector<4x256xf32>
    %c0_8 = arith.constant 0 : index
    %c0_9 = arith.constant 0 : index
    %c0_10 = arith.constant 0 : index
    %10 = vector.load %arg5[%c0_8, %c0_9, %c0_10] : memref<1x4x256xf32, #tpu.memory_space<vmem>>, vector<1x4x256xf32>
    %11 = vector.shape_cast %10 : vector<1x4x256xf32> to vector<4x256xf32>
    %12 = vector.shape_cast %9 : vector<4x256xf32> to vector<1x4x256xf32>
    tpu.vector_store %arg5[%c0_8, %c0_9, %c0_10], %12 {strides = array<i32>} : memref<1x4x256xf32, #tpu.memory_space<vmem>>, vector<1x4x256xf32>,
    return
  }
  func.func @transform_0(%arg0: i32, %arg1: i32) -> (i32, i32, i32) {
    %c0_i32 = arith.constant 0 : i32
    %c0_i32_0 = arith.constant 0 : i32
    %c0_i32_1 = arith.constant 0 : i32
    return %arg0, %c0_i32, %c0_i32_0 : i32, i32, i32
  }
  func.func @transform_1(%arg0: i32, %arg1: i32) -> (i32, i32, i32) {
    %c0_i32 = arith.constant 0 : i32
    %c0_i32_0 = arith.constant 0 : i32
    return %arg0, %arg1, %c0_i32 : i32, i32, i32
  }
  func.func @transform_2(%arg0: i32, %arg1: i32) -> (i32, i32, i32) {
    %c0_i32 = arith.constant 0 : i32
    %c0_i32_0 = arith.constant 0 : i32
    return %arg0, %arg1, %c0_i32 : i32, i32, i32
  }
  func.func @transform_3(%arg0: i32, %arg1: i32) -> (i32, i32, i32) {
    %c0_i32 = arith.constant 0 : i32
    %c0_i32_0 = arith.constant 0 : i32
    return %arg0, %arg1, %c0_i32 : i32, i32, i32
  }
}

module attributes {stable_mosaic.version = 11 : i64} {
  func.func @mask_kernel(%arg0: i32, %arg1: memref<16x16xf32, #tpu.memory_space<vmem>>, %arg2: memref<16x16xf32, #tpu.memory_space<vmem>>, %arg3: memref<1x16x16xf32, #tpu.memory_space<vmem>>, %arg4: memref<1x16x16xf32, #tpu.memory_space<vmem>>) attributes {dimension_semantics = [#tpu.dimension_semantics<parallel>], iteration_bounds = array<i64: 2>, scalar_prefetch = 0 : i64, scratch_operands = 0 : i64, tpu.core_type = #tpu.core_type<tc>, window_params = [{pipeline_mode = #tpu.pipeline_mode<synchronous>, transform_indices = @transform_0, window_bounds = array<i64: 16, 16>}, {pipeline_mode = #tpu.pipeline_mode<synchronous>, transform_indices = @transform_1, window_bounds = array<i64: 16, 16>}, {transform_indices = @transform_2, window_bounds = array<i64: 1, 16, 16>}, {transform_indices = @transform_3, window_bounds = array<i64: 1, 16, 16>}]} {
    %c0 = arith.constant 0 : index
    %c0_0 = arith.constant 0 : index
    %c0_1 = arith.constant 0 : index
    %0 = vector.load %arg3[%c0, %c0_0, %c0_1] : memref<1x16x16xf32, #tpu.memory_space<vmem>>, vector<1x16x16xf32>
    %1 = vector.shape_cast %0 : vector<1x16x16xf32> to vector<16x16xf32>
    %c0_2 = arith.constant 0 : index
    %c0_3 = arith.constant 0 : index
    %2 = vector.load %arg1[%c0_2, %c0_3] : memref<16x16xf32, #tpu.memory_space<vmem>>, vector<16x16xf32>
    %cst = arith.constant dense<0.000000e+00> : vector<16x16xf32>
    %3 = tpu.matmul %2, %1, %cst {dimension_numbers = #tpu.dot_dimension_numbers<[1], [0], [0], [1], [0, 0, 1, 1], [], []>} : vector<16x16xf32>, vector<16x16xf32>, vector<16x16xf32> -> vector<16x16xf32>
    %c0_4 = arith.constant 0 : index
    %c0_5 = arith.constant 0 : index
    %4 = vector.load %arg2[%c0_4, %c0_5] : memref<16x16xf32, #tpu.memory_space<vmem>>, vector<16x16xf32>
    %cst_6 = arith.constant dense<0.000000e+00> : vector<16x16xf32>
    %5 = tpu.matmul %3, %4, %cst_6 {dimension_numbers = #tpu.dot_dimension_numbers<[1], [0], [0], [1], [0, 0, 1, 1], [], []>} : vector<16x16xf32>, vector<16x16xf32>, vector<16x16xf32> -> vector<16x16xf32>
    %6 = vector.shape_cast %5 : vector<16x16xf32> to vector<1x16x16xf32>
    %cst_7 = arith.constant dense<0xFF800000> : vector<1xf32>
    %7 = vector.multi_reduction <maximumf>, %6, %cst_7 [1, 2] : vector<1x16x16xf32> to vector<1xf32>
    %8 = vector.shape_cast %7 : vector<1xf32> to vector<1x1x1xf32>
    %9 = vector.extract %8[0, 0, 0] : f32 from vector<1x1x1xf32>
    %10 = vector.shape_cast %5 : vector<16x16xf32> to vector<1x16x16xf32>
    %cst_8 = arith.constant dense<0x7F800000> : vector<1xf32>
    %11 = vector.multi_reduction <minimumf>, %10, %cst_8 [1, 2] : vector<1x16x16xf32> to vector<1xf32>
    %12 = vector.shape_cast %11 : vector<1xf32> to vector<1x1x1xf32>
    %13 = vector.extract %12[0, 0, 0] : f32 from vector<1x1x1xf32>
    %14 = vector.broadcast %13 : f32 to vector<16x16xf32>
    %15 = arith.subf %5, %14 : vector<16x16xf32>
    %16 = arith.subf %9, %13 : f32
    %cst_9 = arith.constant 9.99999993E-9 : f32
    %17 = arith.addf %16, %cst_9 : f32
    %18 = vector.broadcast %17 : f32 to vector<16x16xf32>
    %19 = arith.divf %15, %18 : vector<16x16xf32>
    %20 = arith.maximumf %19, %1 : vector<16x16xf32>
    %cst_10 = arith.constant 5.000000e-02 : f32
    %21 = vector.broadcast %cst_10 : f32 to vector<16x16xf32>
    %22 = arith.cmpf ogt, %20, %21 : vector<16x16xf32>
    %23 = arith.extui %22 : vector<16x16xi1> to vector<16x16xi32>
    %24 = arith.sitofp %23 : vector<16x16xi32> to vector<16x16xf32>
    %c0_11 = arith.constant 0 : index
    %c0_12 = arith.constant 0 : index
    %c0_13 = arith.constant 0 : index
    %25 = vector.load %arg4[%c0_11, %c0_12, %c0_13] : memref<1x16x16xf32, #tpu.memory_space<vmem>>, vector<1x16x16xf32>
    %26 = vector.shape_cast %25 : vector<1x16x16xf32> to vector<16x16xf32>
    %27 = vector.shape_cast %24 : vector<16x16xf32> to vector<1x16x16xf32>
    tpu.vector_store %arg4[%c0_11, %c0_12, %c0_13], %27 {strides = array<i32>} : memref<1x16x16xf32, #tpu.memory_space<vmem>>, vector<1x16x16xf32>,
    return
  }
  func.func @transform_0(%arg0: i32) -> (i32, i32) {
    %c0_i32 = arith.constant 0 : i32
    %c0_i32_0 = arith.constant 0 : i32
    %c0_i32_1 = arith.constant 0 : i32
    return %c0_i32, %c0_i32_0 : i32, i32
  }
  func.func @transform_1(%arg0: i32) -> (i32, i32) {
    %c0_i32 = arith.constant 0 : i32
    %c0_i32_0 = arith.constant 0 : i32
    %c0_i32_1 = arith.constant 0 : i32
    return %c0_i32, %c0_i32_0 : i32, i32
  }
  func.func @transform_2(%arg0: i32) -> (i32, i32, i32) {
    %c0_i32 = arith.constant 0 : i32
    %c0_i32_0 = arith.constant 0 : i32
    %c0_i32_1 = arith.constant 0 : i32
    return %arg0, %c0_i32, %c0_i32_0 : i32, i32, i32
  }
  func.func @transform_3(%arg0: i32) -> (i32, i32, i32) {
    %c0_i32 = arith.constant 0 : i32
    %c0_i32_0 = arith.constant 0 : i32
    %c0_i32_1 = arith.constant 0 : i32
    return %arg0, %c0_i32, %c0_i32_0 : i32, i32, i32
  }
}

</mosaic_0001>

<bundles_post_ra>
// kernel: ha_forward.3
= control target key start
LH: loop header
LB: loop body
LE: loop exit
PB: predicated region body
PF: predicated region fallthrough
CT: control target
= control target key end

     0   :  { %s506_s12 = smov 0   ;;  %s508_s13 = smov 0   ;;  %s542_s0 = inlined_call_operand.vmem [shape: f32[2,1,256], index: 0, kind: input, shape index: {}]   ;;  %s543_s1 = inlined_call_operand.vmem [shape: f32[2,4,256], index: 1, kind: input, shape index: {}]   ;;  %s544_s2 = inlined_call_operand.vmem [shape: f32[2,4,256], index: 2, kind: output, shape index: {0}]   ;;  %s545_s3 = inlined_call_operand.vmem [shape: f32[2,4,256], index: 3, kind: output, shape index: {1}]  }
   0x1   :  { %s510_s14 = smov 0  }
   0x2 LB: > { %s26_s15 = sadd.s32 1, %s480_s13  ;;  %p425_p0 = scmp.ge.s32.totalorder %s484_s14, 1  ;;  %s484_s14 = sphi %s510_s14, %s14_s14   ;;  %s480_s13 = sphi %s508_s13, %s547_s13   ;;  %s476_s12 = sphi %s506_s12, %s546_s12  }
   0x3   : > { %p28_p1 = scmp.ge.s32.totalorder %s26_s15, 2  ;;  %p171_p2 = scmp.lt.s32.totalorder %s484_s14, 3 }
   0x5   : > { %s549_s15 = smov (%p28_p1, %s26_s15), 0  ;;  %p172_p3 = pnand %p425_p0, %p171_p2 }
   0x6   : > { %p216_p4 = scmp.lt.s32.totalorder (!%p172_p3), %s476_s12, 1 }
   0x7   : > { %175 = sbr.rel (%p172_p3) target bundleno = 27 (0x1b), region = 28 }
   0xc   : > { %v250_v0 = vlaneseq  ;;  %s551_s12 = smov (!%p216_p4, %s476_s12), 1 }
   0xd   : > { %s426_s16 = sshll.u32 %s551_s12, 1  ;;  %s435_s17 = sshll.u32 %s551_s12, 3 }
   0xe   : > { %v251_v1 = vshrl.u32 %v250_v0, 7  ;;  %s219_s20 = scalar_lea.vmem %s542_s0, %s426_s16  ;;  %s228_s23 = scalar_lea.vmem %s543_s1, %s435_s17 }
   0xf   : > { %v247_v4 = vld [vmem:[%s219_s20] sm:$0x3]  ;;  %s237_s26 = scalar_lea.vmem %s544_s2, %s435_s17  ;;  %s246_s29 = scalar_lea.vmem %s545_s3, %s435_s17 }
  0x10   : > { %v252_v2 = vsub.s32 0, %v251_v1  ;;  %v256_v3 = vsub.s32 1, %v251_v1  ;;  %v248_v7 = vld [vmem:[%s228_s23] sm:$0xff] }
  0x12   : > { %v253_v5 = vrot.slane %v247_v4, %v252_v2  ;;  %v257_v6 = vrot.slane %v247_v4, %v256_v3 }
  0x14   : > { %v258_v8 = vcombine.low %v253_v5, %v257_v6 }
  0x16   : > { %v260_v9 = vmul.f32 %v258_v8, %v248_v7 }
  0x18   : > { %261 = vst [vmem:[%s237_s26] sm:$0xff] %v260_v9  ;;  %v262_v10 = vsub.f32 %v248_v7, %v260_v9 }
  0x1a   : > { %263 = vst [vmem:[%s246_s29] sm:$0xff] %v262_v10 }
  0x1b PF: > { %s14_s14 = sadd.s32 1, %s484_s14   ;;  %s546_s12 = smov %s480_s13 }
  0x1c   : > { %p11_p5 = scmp.ge.s32.totalorder %s14_s14, 4   ;;  %s547_s13 = smov %s549_s15 }
  0x1e   :  { %13 = sbr.rel (!%p11_p5) target bundleno = 2 (0x2), region = 73 }

// kernel: ha_forward.2
= control target key start
LH: loop header
LB: loop body
LE: loop exit
PB: predicated region body
PF: predicated region fallthrough
CT: control target
= control target key end

     0   :  { %s523_s12 = smov 0   ;;  %s569_s0 = inlined_call_operand.vmem [shape: f32[16,16], index: 0, kind: input, shape index: {}, may-alias: {0,1}]   ;;  %s570_s1 = inlined_call_operand.vmem [shape: f32[16,16], index: 1, kind: input, shape index: {}, may-alias: {0,1}]   ;;  %s571_s2 = inlined_call_operand.vmem [shape: f32[2,16,16], index: 2, kind: input, shape index: {}]   ;;  %s572_s3 = inlined_call_operand.vmem [shape: f32[2,16,16], index: 3, kind: output, shape index: {}]  }
   0x1 LB: > { %s438_s13 = sadd.s32 4294967295, %s500_s12   ;;  %p442_p0 = scmp.ge.s32.totalorder %s500_s12, 1  ;;  %s500_s12 = sphi %s523_s12, %s13_s12  }
   0x2   : > { %p137_p1 = scmp.lt.s32.totalorder %s500_s12, 3 }
   0x4   : > { %p138_p2 = pnand %p442_p0, %p137_p1 }
   0x5   : > { %p161_p3 = scmp.lt.s32.totalorder (!%p138_p2), %s438_s13, 1 }
   0x6   : > { %141 = sbr.rel (%p138_p2) target bundleno = 643 (0x283), region = 32 }
   0xb   : > { %v173_v0 = vld [vmem:[%s569_s0] sm:$0xff]  ;;  %vm175_vm0 = vcmask 130048   ;;  %s574_s13 = smov (!%p161_p3, %s438_s13), 1  ;;  %v174_v3 = vld [vmem:[%s569_s0 + $0x8] sm:$0xff]  ;;  %v502_v39 = vmov 0.0  }
   0xc   : > { %469 = vmatprep.mubr.msk.f32.mxu0 %vm175_vm0, %v173_v0  ;;  %s455_s16 = sshll.u32 %s574_s13, 4  ;;  %v258_v4 = vld [vmem:[%s570_s1 + $0x8] sm:$0xff]  ;;  %v257_v5 = vld [vmem:[%s570_s1] sm:$0xff] }
   0xd   : > { %s165_s19 = scalar_lea.vmem %s571_s2, %s455_s16  ;;  %472 = vmatprep.subr.mxu1 %v258_v4  ;;  %s170_s5 = scalar_lea.vmem %s572_s3, %s455_s16 }
   0xe   : > { %v172_v1 = vld [vmem:[%s165_s19 + $0x8] sm:$0xff]  ;;  %v171_v2 = vld [vmem:[%s165_s19] sm:$0xff]  ;;  %473 = vmatpush3.msra.mxu1 %v258_v4 }
   0xf   : > { %465 = vmatprep.subr.mxu0 %v172_v1  ;;  %474 = vmatprep.subr.mxu1 %v257_v5 }
  0x10   : > { %466 = vmatpush3.msra.mxu0 %v172_v1  ;;  %475 = vmatpush3.msra.mxu1 %v257_v5 }
  0x11   : > { %467 = vmatprep.subr.mxu0 %v171_v2 }
  0x12   : > { %468 = vmatpush3.msra.mxu0 %v171_v2 }
  0x13   : > { %470 = vmatmul.mubr.msk.f32.vlgmr.msra.gmra.mxu0 %vm175_vm0, %v174_v3 }
  0xd3   : > { %v471_v6 = vpop.f32.mrf.mxu0 }
  0xd5   : > { %v248_v7 = vpop.f32.mrf.mxu0 }
  0xd6   : > { %476 = vmatprep.mubr.msk.f32.mxu1 %vm175_vm0, %v248_v7 }
  0xd7   : > { %477 = vmatmul.mubr.msk.f32.vlgmr.msra.gmra.mxu1 %vm175_vm0, %v471_v6 }
 0x197   : > { %v478_v8 = vpop.f32.mrf.mxu1 }
 0x198   : > { %v341_v11 = vsel %vm175_vm0, %v478_v8, -inf  ;;  %v353_v14 = vsel %vm175_vm0, %v478_v8, inf }
 0x199   : > { %v331_v9 = vpop.f32.mrf.mxu1 }
 0x19a   : > { %v340_v10 = vsel %vm175_vm0, %v331_v9, -inf  ;;  %v352_v13 = vsel %vm175_vm0, %v331_v9, inf }
 0x19b   : > { %v342_v12 = vmax.f32 %v340_v10, %v341_v11  ;;  %v354_v15 = vmin.f32 %v352_v13, %v353_v14 }
 0x19d   : > { %343 = vmax.xlane.f32.xlu0 %v342_v12 }
 0x1a1   : > { %355 = vmin.xlane.f32.xlu0 %v354_v15 }
 0x226   : > { %v344_v16 = vpop.xlane.xlu0 %343 }
 0x227   : > { %v345_v17 = vrot.slane %v344_v16, 4 }
 0x229   : > { %v346_v18 = vmax.f32 %v344_v16, %v345_v17 }
 0x22a   : > { %v356_v19 = vpop.xlane.xlu0 %355 }
 0x22b   : > { %v347_v20 = vrot.slane %v346_v18, 2  ;;  %v357_v21 = vrot.slane %v356_v19, 4 }
 0x22d   : > { %v358_v22 = vmin.f32 %v356_v19, %v357_v21  ;;  %v348_v23 = vmax.f32 %v346_v18, %v347_v20 }
 0x22f   : > { %v359_v24 = vrot.slane %v358_v22, 2  ;;  %v349_v25 = vrot.slane %v348_v23, 1 }
 0x231   : > { %v360_v26 = vmin.f32 %v358_v22, %v359_v24  ;;  %v350_v27 = vmax.f32 %v348_v23, %v349_v25 }
 0x233   : > { %479 = vpush %v350_v27  ;;  %v361_v28 = vrot.slane %v360_v26, 1 }
 0x235   : > { %v362_v29 = vmin.f32 %v360_v26, %v361_v28 }
 0x237   : > { %481 = vpush %v362_v29 }
 0x264   : > { %s480_s26 = spop %479 }
 0x268   : > { %s482_s27 = spop %481 }
 0x269   : > { %s367_s28 = ssub.f32 %s480_s26, %s482_s27  ;;  %v364_v31 = vstv %s482_s27 }
 0x26a   : > { %v365_v32 = vsub.f32 %v331_v9, %v364_v31  ;;  %v366_v33 = vsub.f32 %v478_v8, %v364_v31 }
 0x26b   : > { %s368_s29 = sadd.f32 1e-08, %s367_s28 }
 0x26d   : > { %v369_v30 = vstv %s368_s29 }
 0x26e   : > { %492 = vrcp.f32 %v369_v30 }
 0x27b   : > { %v493_v34 = vpop.eup %492 }
 0x27c   : > { %v371_v35 = vmul.f32 %v493_v34, %v365_v32  ;;  %v372_v36 = vmul.f32 %v493_v34, %v366_v33 }
 0x27e   : > { %v373_v37 = vmax.f32 %v371_v35, %v171_v2  ;;  %v374_v38 = vmax.f32 %v372_v36, %v172_v1 }
 0x280   : > { %vm375_vm1 = vcmp.gt.f32.partialorder %v373_v37, 0.05  ;;  %vm376_vm2 = vcmp.gt.f32.partialorder %v374_v38, 0.05 }
 0x281   : > { %v451_v40 = vsel %vm375_vm1, 1.0, %v502_v39  ;;  %v452_v41 = vsel %vm376_vm2, 1.0, %v502_v39 }
 0x282   : > { %381 = vst.msk [vmem:[%s170_s5] sm:$0xff] %vm175_vm0, %v451_v40  ;;  %382 = vst.msk [vmem:[%s170_s5 + $0x8] sm:$0xff] %vm175_vm0, %v452_v41 }
 0x283 PF: > { %s13_s12 = sadd.s32 1, %s500_s12  }
 0x284   : > { %p10_p4 = scmp.ge.s32.totalorder %s13_s12, 4  }
 0x286   :  { %12 = sbr.rel (!%p10_p4) target bundleno = 1 (0x1), region = 62 }

</bundles_post_ra>
